<compile_context>
chip_gen: v7x
topology: tpu7x:2x2x1
jax: 0.10.0
libtpu: 0.0.40
codegen_flags: <defaults>
</compile_context>

<pallas_src>
import jax
import jax.numpy as jnp
from jax.experimental import pallas as pl
from jax.experimental.pallas import tpu as pltpu

# Module hyper-parameters (match the PyTorch spec).
INPUT_DIM = 7
HIDDEN_DIM = 64
LATENT_DIM = 32
NUM_NODES = 16

NUM_LAYERS = 6
FPAD = 128  # uniform, lane-dense padded feature width (covers 7/32/64)


def gcn_autoencoder_kernel(a_ref, x_ref, w_ref, b_ref, recon_ref, latent_ref):
    """Fused forward pass: 6 GCN layers, each relu(A_norm @ (h W_l) + b_l).

    a_ref:      (N, N)            f32 normalized adjacency
    x_ref:      (N, FPAD)         f32 zero-padded node features
    w_ref:      (6, FPAD, FPAD)   f32 zero-padded packed weights
    b_ref:      (6, 1, FPAD)      f32 zero-padded packed biases
    recon_ref:  (N, FPAD)         f32 (valid cols = INPUT_DIM)
    latent_ref: (N, FPAD)         f32 (valid cols = LATENT_DIM)
    """
    a_bf16 = a_ref[...].astype(jnp.bfloat16)   # MXU operand; degree-normalized -> bf16 safe
    h = x_ref[...]                             # (N, FPAD) f32

    def gcn(h, layer):
        # Static slices on the packed slabs are free (no extra DMA / copy).
        w = w_ref[layer]                       # (FPAD, FPAD)
        b = b_ref[layer]                       # (1, FPAD)
        # bf16 MXU inputs, f32 accumulation.
        xw = jnp.dot(h.astype(jnp.bfloat16), w.astype(jnp.bfloat16),
                     preferred_element_type=jnp.float32)
        agg = jnp.dot(a_bf16, xw.astype(jnp.bfloat16),
                      preferred_element_type=jnp.float32)
        # bias-add + ReLU stay f32 on the VPU (v5e has no bf16 VPU path).
        return jnp.maximum(agg + b, 0.0)

    # Encoder (layers 0..2) -- fixed trip count, fully unrolled.
    for layer in range(3):
        h = gcn(h, layer)
    latent_ref[...] = h                        # lane-dense (N, 128) store

    # Decoder (layers 3..5).
    for layer in range(3, NUM_LAYERS):
        h = gcn(h, layer)
    recon_ref[...] = h                         # lane-dense (N, 128) store


def rna_graph_autoencoder(a_norm, x, params):
    """params: list of 6 (W, b) tuples. Returns (reconstructed, latent)."""
    n = x.shape[0]

    # Pack weights / biases into two zero-padded slabs (2 DMAs instead of 12).
    w_pack = jnp.zeros((NUM_LAYERS, FPAD, FPAD), jnp.float32)
    b_pack = jnp.zeros((NUM_LAYERS, 1, FPAD), jnp.float32)
    for i, (w, b) in enumerate(params):
        w_pack = w_pack.at[i, : w.shape[0], : w.shape[1]].set(w)
        b_pack = b_pack.at[i, 0, : b.shape[0]].set(b)

    # Zero-pad node features to the uniform lane-dense width.
    x_pad = jnp.zeros((n, FPAD), jnp.float32).at[:, : x.shape[1]].set(x)

    vmem_spec = pl.BlockSpec(memory_space=pltpu.MemorySpace.VMEM)

    recon_pad, latent_pad = pl.pallas_call(
        gcn_autoencoder_kernel,
        out_shape=(
            jax.ShapeDtypeStruct((n, FPAD), jnp.float32),   # reconstructed (padded)
            jax.ShapeDtypeStruct((n, FPAD), jnp.float32),   # latent (padded)
        ),
        in_specs=[vmem_spec] * 4,
        out_specs=(vmem_spec, vmem_spec),
    )(a_norm, x_pad, w_pack, b_pack)

    # Strip padding outside the kernel (padded columns are exactly zero).
    return recon_pad[:, :INPUT_DIM], latent_pad[:, :LATENT_DIM]


def build_norm_adj(edge_index, num_nodes):
    """D^{-1/2} (A + I) D^{-1/2}, matching torch_geometric gcn_norm."""
    row, col = edge_index  # row = source, col = target
    adj = jnp.zeros((num_nodes, num_nodes), jnp.float32)
    adj = adj.at[col, row].set(1.0)                     # A[target, source]
    adj = adj + jnp.eye(num_nodes, dtype=jnp.float32)   # add self loops
    deg = adj.sum(axis=1)                               # in-degree incl. self loop
    dinv = jnp.where(deg > 0, 1.0 / jnp.sqrt(deg), 0.0)
    return dinv[:, None] * adj * dinv[None, :]


def glorot(key, fan_in, fan_out):
    limit = (6.0 / (fan_in + fan_out)) ** 0.5
    return jax.random.uniform(key, (fan_in, fan_out), jnp.float32, -limit, limit)


def init_params(key):
    dims = [
        (INPUT_DIM, HIDDEN_DIM), (HIDDEN_DIM, HIDDEN_DIM), (HIDDEN_DIM, LATENT_DIM),
        (LATENT_DIM, HIDDEN_DIM), (HIDDEN_DIM, HIDDEN_DIM), (HIDDEN_DIM, INPUT_DIM),
    ]
    params = []
    for d_in, d_out in dims:
        key, sub = jax.random.split(key)
        w = glorot(sub, d_in, d_out)
        b = jnp.zeros((d_out,), jnp.float32)   # GCNConv bias init = zeros
        params.append((w, b))
    return params


if __name__ == "__main__":
    key = jax.random.PRNGKey(0)
    key, kx = jax.random.split(key)

    # Node features: (N, input_dim)
    x = jax.random.normal(kx, (NUM_NODES, INPUT_DIM), jnp.float32)

    # Deterministic ring graph edge_index (2, E), bidirectional.
    src = jnp.arange(NUM_NODES, dtype=jnp.int32)
    dst = (src + 1) % NUM_NODES
    edge_index = jnp.stack(
        [jnp.concatenate([src, dst]), jnp.concatenate([dst, src])], axis=0)

    a_norm = build_norm_adj(edge_index, NUM_NODES)
    params = init_params(key)

    recon, latent = rna_graph_autoencoder(a_norm, x, params)
    jax.block_until_ready((recon, latent))

    assert recon.shape == (NUM_NODES, INPUT_DIM)
    assert latent.shape == (NUM_NODES, LATENT_DIM)
    print("KERNEL_OK")
</pallas_src>

<mosaic_0001>
module attributes {stable_mosaic.version = 11 : i64} {
  func.func @gcn_autoencoder_kernel(%arg0: memref<16x16xf32, #tpu.memory_space<vmem>>, %arg1: memref<16x128xf32, #tpu.memory_space<vmem>>, %arg2: memref<6x128x128xf32, #tpu.memory_space<vmem>>, %arg3: memref<6x1x128xf32, #tpu.memory_space<vmem>>, %arg4: memref<16x128xf32, #tpu.memory_space<vmem>>, %arg5: memref<16x128xf32, #tpu.memory_space<vmem>>) attributes {dimension_semantics = [], scalar_prefetch = 0 : i64, scratch_operands = 0 : i64, tpu.core_type = #tpu.core_type<tc>} {
    %c0 = arith.constant 0 : index
    %c0_0 = arith.constant 0 : index
    %0 = vector.load %arg0[%c0, %c0_0] : memref<16x16xf32, #tpu.memory_space<vmem>>, vector<16x16xf32>
    %1 = arith.truncf %0 : vector<16x16xf32> to vector<16x16xbf16>
    %c0_1 = arith.constant 0 : index
    %c0_2 = arith.constant 0 : index
    %2 = vector.load %arg1[%c0_1, %c0_2] : memref<16x128xf32, #tpu.memory_space<vmem>>, vector<16x128xf32>
    %c0_3 = arith.constant 0 : index
    %c0_4 = arith.constant 0 : index
    %c0_5 = arith.constant 0 : index
    %3 = vector.load %arg2[%c0_3, %c0_4, %c0_5] : memref<6x128x128xf32, #tpu.memory_space<vmem>>, vector<1x128x128xf32>
    %4 = vector.shape_cast %3 : vector<1x128x128xf32> to vector<128x128xf32>
    %c0_6 = arith.constant 0 : index
    %c0_7 = arith.constant 0 : index
    %c0_8 = arith.constant 0 : index
    %5 = vector.load %arg3[%c0_6, %c0_7, %c0_8] : memref<6x1x128xf32, #tpu.memory_space<vmem>>, vector<1x1x128xf32>
    %6 = vector.shape_cast %5 : vector<1x1x128xf32> to vector<1x128xf32>
    %7 = arith.truncf %2 : vector<16x128xf32> to vector<16x128xbf16>
    %8 = arith.truncf %4 : vector<128x128xf32> to vector<128x128xbf16>
    %cst = arith.constant dense<0.000000e+00> : vector<16x128xf32>
    %9 = tpu.matmul %7, %8, %cst {dimension_numbers = #tpu.dot_dimension_numbers<[1], [0], [0], [1], [0, 0, 1, 1], [], []>} : vector<16x128xbf16>, vector<128x128xbf16>, vector<16x128xf32> -> vector<16x128xf32>
    %10 = arith.truncf %9 : vector<16x128xf32> to vector<16x128xbf16>
    %cst_9 = arith.constant dense<0.000000e+00> : vector<16x128xf32>
    %11 = tpu.matmul %1, %10, %cst_9 {dimension_numbers = #tpu.dot_dimension_numbers<[1], [0], [0], [1], [0, 0, 1, 1], [], []>} : vector<16x16xbf16>, vector<16x128xbf16>, vector<16x128xf32> -> vector<16x128xf32>
    %12 = vector.broadcast %6 : vector<1x128xf32> to vector<16x128xf32>
    %13 = arith.addf %11, %12 : vector<16x128xf32>
    %cst_10 = arith.constant 0.000000e+00 : f32
    %14 = vector.broadcast %cst_10 : f32 to vector<16x128xf32>
    %15 = arith.maximumf %13, %14 : vector<16x128xf32>
    %c1 = arith.constant 1 : index
    %c0_11 = arith.constant 0 : index
    %c0_12 = arith.constant 0 : index
    %16 = vector.load %arg2[%c1, %c0_11, %c0_12] : memref<6x128x128xf32, #tpu.memory_space<vmem>>, vector<1x128x128xf32>
    %17 = vector.shape_cast %16 : vector<1x128x128xf32> to vector<128x128xf32>
    %c1_13 = arith.constant 1 : index
    %c0_14 = arith.constant 0 : index
    %c0_15 = arith.constant 0 : index
    %18 = vector.load %arg3[%c1_13, %c0_14, %c0_15] : memref<6x1x128xf32, #tpu.memory_space<vmem>>, vector<1x1x128xf32>
    %19 = vector.shape_cast %18 : vector<1x1x128xf32> to vector<1x128xf32>
    %20 = arith.truncf %15 : vector<16x128xf32> to vector<16x128xbf16>
    %21 = arith.truncf %17 : vector<128x128xf32> to vector<128x128xbf16>
    %cst_16 = arith.constant dense<0.000000e+00> : vector<16x128xf32>
    %22 = tpu.matmul %20, %21, %cst_16 {dimension_numbers = #tpu.dot_dimension_numbers<[1], [0], [0], [1], [0, 0, 1, 1], [], []>} : vector<16x128xbf16>, vector<128x128xbf16>, vector<16x128xf32> -> vector<16x128xf32>
    %23 = arith.truncf %22 : vector<16x128xf32> to vector<16x128xbf16>
    %cst_17 = arith.constant dense<0.000000e+00> : vector<16x128xf32>
    %24 = tpu.matmul %1, %23, %cst_17 {dimension_numbers = #tpu.dot_dimension_numbers<[1], [0], [0], [1], [0, 0, 1, 1], [], []>} : vector<16x16xbf16>, vector<16x128xbf16>, vector<16x128xf32> -> vector<16x128xf32>
    %25 = vector.broadcast %19 : vector<1x128xf32> to vector<16x128xf32>
    %26 = arith.addf %24, %25 : vector<16x128xf32>
    %cst_18 = arith.constant 0.000000e+00 : f32
    %27 = vector.broadcast %cst_18 : f32 to vector<16x128xf32>
    %28 = arith.maximumf %26, %27 : vector<16x128xf32>
    %c2 = arith.constant 2 : index
    %c0_19 = arith.constant 0 : index
    %c0_20 = arith.constant 0 : index
    %29 = vector.load %arg2[%c2, %c0_19, %c0_20] : memref<6x128x128xf32, #tpu.memory_space<vmem>>, vector<1x128x128xf32>
    %30 = vector.shape_cast %29 : vector<1x128x128xf32> to vector<128x128xf32>
    %c2_21 = arith.constant 2 : index
    %c0_22 = arith.constant 0 : index
    %c0_23 = arith.constant 0 : index
    %31 = vector.load %arg3[%c2_21, %c0_22, %c0_23] : memref<6x1x128xf32, #tpu.memory_space<vmem>>, vector<1x1x128xf32>
    %32 = vector.shape_cast %31 : vector<1x1x128xf32> to vector<1x128xf32>
    %33 = arith.truncf %28 : vector<16x128xf32> to vector<16x128xbf16>
    %34 = arith.truncf %30 : vector<128x128xf32> to vector<128x128xbf16>
    %cst_24 = arith.constant dense<0.000000e+00> : vector<16x128xf32>
    %35 = tpu.matmul %33, %34, %cst_24 {dimension_numbers = #tpu.dot_dimension_numbers<[1], [0], [0], [1], [0, 0, 1, 1], [], []>} : vector<16x128xbf16>, vector<128x128xbf16>, vector<16x128xf32> -> vector<16x128xf32>
    %36 = arith.truncf %35 : vector<16x128xf32> to vector<16x128xbf16>
    %cst_25 = arith.constant dense<0.000000e+00> : vector<16x128xf32>
    %37 = tpu.matmul %1, %36, %cst_25 {dimension_numbers = #tpu.dot_dimension_numbers<[1], [0], [0], [1], [0, 0, 1, 1], [], []>} : vector<16x16xbf16>, vector<16x128xbf16>, vector<16x128xf32> -> vector<16x128xf32>
    %38 = vector.broadcast %32 : vector<1x128xf32> to vector<16x128xf32>
    %39 = arith.addf %37, %38 : vector<16x128xf32>
    %cst_26 = arith.constant 0.000000e+00 : f32
    %40 = vector.broadcast %cst_26 : f32 to vector<16x128xf32>
    %41 = arith.maximumf %39, %40 : vector<16x128xf32>
    %c0_27 = arith.constant 0 : index
    %c0_28 = arith.constant 0 : index
    %42 = vector.load %arg5[%c0_27, %c0_28] : memref<16x128xf32, #tpu.memory_space<vmem>>, vector<16x128xf32>
    tpu.vector_store %arg5[%c0_27, %c0_28], %41 {strides = array<i32>} : memref<16x128xf32, #tpu.memory_space<vmem>>, vector<16x128xf32>,
    %c3 = arith.constant 3 : index
    %c0_29 = arith.constant 0 : index
    %c0_30 = arith.constant 0 : index
    %43 = vector.load %arg2[%c3, %c0_29, %c0_30] : memref<6x128x128xf32, #tpu.memory_space<vmem>>, vector<1x128x128xf32>
    %44 = vector.shape_cast %43 : vector<1x128x128xf32> to vector<128x128xf32>
    %c3_31 = arith.constant 3 : index
    %c0_32 = arith.constant 0 : index
    %c0_33 = arith.constant 0 : index
    %45 = vector.load %arg3[%c3_31, %c0_32, %c0_33] : memref<6x1x128xf32, #tpu.memory_space<vmem>>, vector<1x1x128xf32>
    %46 = vector.shape_cast %45 : vector<1x1x128xf32> to vector<1x128xf32>
    %47 = arith.truncf %41 : vector<16x128xf32> to vector<16x128xbf16>
    %48 = arith.truncf %44 : vector<128x128xf32> to vector<128x128xbf16>
    %cst_34 = arith.constant dense<0.000000e+00> : vector<16x128xf32>
    %49 = tpu.matmul %47, %48, %cst_34 {dimension_numbers = #tpu.dot_dimension_numbers<[1], [0], [0], [1], [0, 0, 1, 1], [], []>} : vector<16x128xbf16>, vector<128x128xbf16>, vector<16x128xf32> -> vector<16x128xf32>
    %50 = arith.truncf %49 : vector<16x128xf32> to vector<16x128xbf16>
    %cst_35 = arith.constant dense<0.000000e+00> : vector<16x128xf32>
    %51 = tpu.matmul %1, %50, %cst_35 {dimension_numbers = #tpu.dot_dimension_numbers<[1], [0], [0], [1], [0, 0, 1, 1], [], []>} : vector<16x16xbf16>, vector<16x128xbf16>, vector<16x128xf32> -> vector<16x128xf32>
    %52 = vector.broadcast %46 : vector<1x128xf32> to vector<16x128xf32>
    %53 = arith.addf %51, %52 : vector<16x128xf32>
    %cst_36 = arith.constant 0.000000e+00 : f32
    %54 = vector.broadcast %cst_36 : f32 to vector<16x128xf32>
    %55 = arith.maximumf %53, %54 : vector<16x128xf32>
    %c4 = arith.constant 4 : index
    %c0_37 = arith.constant 0 : index
    %c0_38 = arith.constant 0 : index
    %56 = vector.load %arg2[%c4, %c0_37, %c0_38] : memref<6x128x128xf32, #tpu.memory_space<vmem>>, vector<1x128x128xf32>
    %57 = vector.shape_cast %56 : vector<1x128x128xf32> to vector<128x128xf32>
    %c4_39 = arith.constant 4 : index
    %c0_40 = arith.constant 0 : index
    %c0_41 = arith.constant 0 : index
    %58 = vector.load %arg3[%c4_39, %c0_40, %c0_41] : memref<6x1x128xf32, #tpu.memory_space<vmem>>, vector<1x1x128xf32>
    %59 = vector.shape_cast %58 : vector<1x1x128xf32> to vector<1x128xf32>
    %60 = arith.truncf %55 : vector<16x128xf32> to vector<16x128xbf16>
    %61 = arith.truncf %57 : vector<128x128xf32> to vector<128x128xbf16>
    %cst_42 = arith.constant dense<0.000000e+00> : vector<16x128xf32>
    %62 = tpu.matmul %60, %61, %cst_42 {dimension_numbers = #tpu.dot_dimension_numbers<[1], [0], [0], [1], [0, 0, 1, 1], [], []>} : vector<16x128xbf16>, vector<128x128xbf16>, vector<16x128xf32> -> vector<16x128xf32>
    %63 = arith.truncf %62 : vector<16x128xf32> to vector<16x128xbf16>
    %cst_43 = arith.constant dense<0.000000e+00> : vector<16x128xf32>
    %64 = tpu.matmul %1, %63, %cst_43 {dimension_numbers = #tpu.dot_dimension_numbers<[1], [0], [0], [1], [0, 0, 1, 1], [], []>} : vector<16x16xbf16>, vector<16x128xbf16>, vector<16x128xf32> -> vector<16x128xf32>
    %65 = vector.broadcast %59 : vector<1x128xf32> to vector<16x128xf32>
    %66 = arith.addf %64, %65 : vector<16x128xf32>
    %cst_44 = arith.constant 0.000000e+00 : f32
    %67 = vector.broadcast %cst_44 : f32 to vector<16x128xf32>
    %68 = arith.maximumf %66, %67 : vector<16x128xf32>
    %c5 = arith.constant 5 : index
    %c0_45 = arith.constant 0 : index
    %c0_46 = arith.constant 0 : index
    %69 = vector.load %arg2[%c5, %c0_45, %c0_46] : memref<6x128x128xf32, #tpu.memory_space<vmem>>, vector<1x128x128xf32>
    %70 = vector.shape_cast %69 : vector<1x128x128xf32> to vector<128x128xf32>
    %c5_47 = arith.constant 5 : index
    %c0_48 = arith.constant 0 : index
    %c0_49 = arith.constant 0 : index
    %71 = vector.load %arg3[%c5_47, %c0_48, %c0_49] : memref<6x1x128xf32, #tpu.memory_space<vmem>>, vector<1x1x128xf32>
    %72 = vector.shape_cast %71 : vector<1x1x128xf32> to vector<1x128xf32>
    %73 = arith.truncf %68 : vector<16x128xf32> to vector<16x128xbf16>
    %74 = arith.truncf %70 : vector<128x128xf32> to vector<128x128xbf16>
    %cst_50 = arith.constant dense<0.000000e+00> : vector<16x128xf32>
    %75 = tpu.matmul %73, %74, %cst_50 {dimension_numbers = #tpu.dot_dimension_numbers<[1], [0], [0], [1], [0, 0, 1, 1], [], []>} : vector<16x128xbf16>, vector<128x128xbf16>, vector<16x128xf32> -> vector<16x128xf32>
    %76 = arith.truncf %75 : vector<16x128xf32> to vector<16x128xbf16>
    %cst_51 = arith.constant dense<0.000000e+00> : vector<16x128xf32>
    %77 = tpu.matmul %1, %76, %cst_51 {dimension_numbers = #tpu.dot_dimension_numbers<[1], [0], [0], [1], [0, 0, 1, 1], [], []>} : vector<16x16xbf16>, vector<16x128xbf16>, vector<16x128xf32> -> vector<16x128xf32>
    %78 = vector.broadcast %72 : vector<1x128xf32> to vector<16x128xf32>
    %79 = arith.addf %77, %78 : vector<16x128xf32>
    %cst_52 = arith.constant 0.000000e+00 : f32
    %80 = vector.broadcast %cst_52 : f32 to vector<16x128xf32>
    %81 = arith.maximumf %79, %80 : vector<16x128xf32>
    %c0_53 = arith.constant 0 : index
    %c0_54 = arith.constant 0 : index
    %82 = vector.load %arg4[%c0_53, %c0_54] : memref<16x128xf32, #tpu.memory_space<vmem>>, vector<16x128xf32>
    tpu.vector_store %arg4[%c0_53, %c0_54], %81 {strides = array<i32>} : memref<16x128xf32, #tpu.memory_space<vmem>>, vector<16x128xf32>,
    return
  }
}

</mosaic_0001>

<bundles_post_ra>
// kernel: tpu_custom_call.1
= control target key start
LH: loop header
LB: loop body
LE: loop exit
PB: predicated region body
PF: predicated region fallthrough
CT: control target
= control target key end

     0   :  { %11 = vsyncpa [#allocation3], 0  ;;  %s1419_s0 = inlined_call_operand.hbm [shape: f32[16,16], index: 0, kind: input, shape index: {}]   ;;  %s1420_s1 = inlined_call_operand.hbm [shape: f32[16,128], index: 1, kind: input, shape index: {}]   ;;  %s1421_s2 = inlined_call_operand.hbm [shape: f32[6,128,128], index: 2, kind: input, shape index: {}]   ;;  %s1422_s3 = inlined_call_operand.vmem [shape: f32[6,1,128], index: 3, kind: input, shape index: {}]   ;;  %s1423_s4 = inlined_call_operand.hbm [shape: f32[16,128], index: 4, kind: output, shape index: {0}]   ;;  %s1424_s5 = inlined_call_operand.hbm [shape: f32[16,128], index: 5, kind: output, shape index: {1}]  }
   0x1   :  { %12 = vsyncpa [#allocation6], 0 }
   0x2   :  { %13 = vsyncpa [#allocation4], 0 }
   0x3   :  { %14 = vsyncpa [#allocation10], 0  ;;  %s1188_s18 = smov [#allocation5]   ;;  %s1189_s20 = smov [#allocation2]  }
   0x4   :  { %s32_s19 = sshll.u32 %s1188_s18, 4  ;;  %s20_s21 = sshll.u32 %s1189_s20, 4  ;;  %s33_s19 = int_to_ptr.vmem [resolvable:$true] %s32_s19  ;;  %s1227_s21 = int_to_ptr.vmem [resolvable:$true] %s20_s21 }
   0x5   :  { %s1070_s24 = scalar_lea.hbm %s1420_s1, 256 }
   0x6   :  { %p1071_p0 = scmp.ne.s32.totalorder %s1420_s1, %s1070_s24  ;;  %p1074_p1 = scmp.lt.u32.totalorder %s1070_s24, %s1420_s1 }
   0x8   :  { %p1076_p2 = pnand %p1074_p1, %p1071_p0 }
   0xa   :  { %1079 = shalt.err (!%p1076_p2)
}
   0xb   :  { %s1080_s29 = scalar_lea.vmem %s33_s19, 256  ;;  %p1085_p4 = scmp.lt.s32.totalorder %s33_s19, %s33_s19 }
   0xc   :  { %p1081_p3 = scmp.ne.s32.totalorder %s33_s19, %s1080_s29  ;;  %p1086_p5 = scmp.lt.s32.totalorder %s1080_s29, %s1080_s29 }
   0xe   :  { %p1087_p6 = por %p1086_p5, %p1085_p4 }
  0x10   :  { %p1088_p7 = pnand %p1087_p6, %p1081_p3 }
  0x12   :  { %1091 = shalt.err (!%p1088_p7)
}
  0x13   :  { %s1190_s30 = smov 128   ;;  %s1191_s6 = smov 8  }
  0x14   :  { %38 = dma.hbm_to_vmem [thread:$0]  %s1420_s1, 256, %s33_s19, [#allocation6], %s1190_s30, %s1190_s30, %s1191_s6  }
  0x15   :  { %s1092_s11 = scalar_lea.hbm %s1419_s0, 256 }
  0x16   :  { %p1093_p8 = scmp.ne.s32.totalorder %s1419_s0, %s1092_s11  ;;  %p1096_p9 = scmp.lt.u32.totalorder %s1092_s11, %s1419_s0 }
  0x18   :  { %p1098_p10 = pnand %p1096_p9, %p1093_p8 }
  0x1a   :  { %1101 = shalt.err (!%p1098_p10)
}
  0x1b   :  { %s1102_s16 = scalar_lea.vmem %s1227_s21, 256  ;;  %p1107_p12 = scmp.lt.s32.totalorder %s1227_s21, %s1227_s21 }
  0x1c   :  { %p1103_p11 = scmp.ne.s32.totalorder %s1227_s21, %s1102_s16  ;;  %p1108_p13 = scmp.lt.s32.totalorder %s1102_s16, %s1102_s16 }
  0x1e   :  { %p1109_p0 = por %p1108_p13, %p1107_p12 }
  0x20   :  { %p1110_p1 = pnand %p1109_p0, %p1103_p11 }
  0x22   :  { %1113 = shalt.err (!%p1110_p1)
}
  0x23   :  { %26 = dma.hbm_to_vmem [thread:$0]  %s1419_s0, 256, %s1227_s21, [#allocation3], %s1190_s30, %s1190_s30, %s1191_s6  }
  0x24   :  { %s1192_s18 = smov [#allocation7]   ;;  %s1114_s23 = scalar_lea.hbm %s1421_s2, 12288 }
  0x25   :  { %s44_s19 = sshll.u32 %s1192_s18, 4  ;;  %p1115_p2 = scmp.ne.s32.totalorder %s1421_s2, %s1114_s23  ;;  %s45_s19 = int_to_ptr.vmem [resolvable:$true] %s44_s19 }
  0x26   :  { %p1118_p3 = scmp.lt.u32.totalorder %s1114_s23, %s1421_s2 }
  0x28   :  { %p1120_p4 = pnand %p1118_p3, %p1115_p2 }
  0x2a   :  { %1123 = shalt.err (!%p1120_p4)
}
  0x2b   :  { %s1124_s28 = scalar_lea.vmem %s45_s19, 12288  ;;  %p1129_p6 = scmp.lt.s32.totalorder %s45_s19, %s45_s19 }
  0x2c   :  { %p1125_p5 = scmp.ne.s32.totalorder %s45_s19, %s1124_s28  ;;  %p1130_p7 = scmp.lt.s32.totalorder %s1124_s28, %s1124_s28 }
  0x2e   :  { %p1131_p8 = por %p1130_p7, %p1129_p6 }
  0x30   :  { %p1132_p9 = pnand %p1131_p8, %p1125_p5 }
  0x32   :  { %1135 = shalt.err (!%p1132_p9)
}
  0x33   :  { %50 = dma.hbm_to_vmem [thread:$0]  %s1421_s2, 12288, %s45_s19, [#allocation6], %s1190_s30, %s1190_s30, %s1191_s6  }
  0x34   :  { %1180 = dma.done.wait [#allocation3], 256  }
  0x35   :  { %1181 = vsyncadd [#allocation3], 4294967040 }
  0x36   :  { %1182 = dma.done.wait [#allocation6], 12544  }
  0x37   :  { %1183 = vsyncadd [#allocation6], 4294954752  ;;  %v1193_v0 = vmov 0.0   ;;  %vm1194_vm0 = vmmov 0   ;;  %v68_v1 = vld [vmem:[#allocation7] sm:$0xff]  ;;  %v69_v2 = vld [vmem:[#allocation7 + $0x8] sm:$0xff] }
  0x38   :  { %905 = vmatprep.subr.bf16.mxu0 %v1193_v0  ;;  %921 = vmatprep.mubr.msk.bf16.mxu0 %vm1194_vm0, %v1193_v0  ;;  %v70_v3 = vld [vmem:[#allocation7 + $0x10] sm:$0xff]  ;;  %v86_v4 = vpack.c.bf16 %v69_v2, %v68_v1  ;;  %v71_v5 = vld [vmem:[#allocation7 + $0x18] sm:$0xff]  ;;  %v72_v7 = vld [vmem:[#allocation7 + $0x20] sm:$0xff]  ;;  %vm142_vm1 = vcmask 130048   ;;  %s1195_s15 = smov [#allocation9]  }
  0x39   :  { %925 = vmatprep.subr.bf16.mxu1 %v1193_v0  ;;  %927 = vmatprep.mubr.msk.bf16.mxu1 %vm1194_vm0, %v1193_v0  ;;  %v87_v6 = vpack.c.bf16 %v71_v5, %v70_v3  ;;  %v73_v8 = vld [vmem:[#allocation7 + $0x28] sm:$0xff]  ;;  %v74_v10 = vld [vmem:[#allocation7 + $0x30] sm:$0xff]  ;;  %v75_v11 = vld [vmem:[#allocation7 + $0x38] sm:$0xff]  ;;  %s805_s16 = sshll.u32 %s1195_s15, 4  ;;  %s806_s16 = int_to_ptr.vmem [resolvable:$true] %s805_s16 }
  0x3a   :  { %906 = vmatpush3.bf16.msra.mxu0 %v86_v4  ;;  %v88_v9 = vpack.c.bf16 %v73_v8, %v72_v7  ;;  %v89_v12 = vpack.c.bf16 %v75_v11, %v74_v10  ;;  %v76_v13 = vld [vmem:[#allocation7 + $0x40] sm:$0xff]  ;;  %v77_v14 = vld [vmem:[#allocation7 + $0x48] sm:$0xff]  ;;  %v78_v16 = vld [vmem:[#allocation7 + $0x50] sm:$0xff]  ;;  %s1136_s1 = scalar_lea.vmem %s806_s16, 256  ;;  %p1141_p11 = scmp.lt.s32.totalorder %s806_s16, %s806_s16 }
  0x3b   :  { %907 = vmatprep.subr.bf16.mxu0 %v1193_v0  ;;  %v90_v15 = vpack.c.bf16 %v77_v14, %v76_v13  ;;  %v79_v17 = vld [vmem:[#allocation7 + $0x58] sm:$0xff]  ;;  %v80_v19 = vld [vmem:[#allocation7 + $0x60] sm:$0xff]  ;;  %v81_v20 = vld [vmem:[#allocation7 + $0x68] sm:$0xff]  ;;  %p1137_p10 = scmp.ne.s32.totalorder %s806_s16, %s1136_s1  ;;  %p1142_p12 = scmp.lt.s32.totalorder %s1136_s1, %s1136_s1 }
  0x3c   :  { %v91_v18 = vpack.c.bf16 %v79_v17, %v78_v16  ;;  %v92_v21 = vpack.c.bf16 %v81_v20, %v80_v19  ;;  %v82_v22 = vld [vmem:[#allocation7 + $0x70] sm:$0xff]  ;;  %v83_v23 = vld [vmem:[#allocation7 + $0x78] sm:$0xff]  ;;  %v63_v30 = vld [vmem:[#allocation2] sm:$0xff] }
  0x3d   :  { %v93_v24 = vpack.c.bf16 %v83_v23, %v82_v22  ;;  %v66_v25 = vld [vmem:[#allocation5] sm:$0xff]  ;;  %v67_v26 = vld [vmem:[#allocation5 + $0x8] sm:$0xff]  ;;  %v64_v31 = vld [vmem:[#allocation2 + $0x8] sm:$0xff]  ;;  %p1143_p13 = por %p1142_p12, %p1141_p11 }
  0x3e   :  { %908 = vmatpush3.bf16.msra.mxu0 %v87_v6  ;;  %v85_v27 = vpack.c.bf16 %v67_v26, %v66_v25  ;;  %v190_v33 = vld [vmem:[#allocation7 + $0x80] sm:$0xff]  ;;  %v191_v34 = vld [vmem:[#allocation7 + $0x88] sm:$0xff]  ;;  %v1295_v37 = vpack.c.bf16 %v64_v31, %v63_v30  ;;  %v192_v39 = vld [vmem:[#allocation7 + $0x90] sm:$0xff] }
  0x3f   :  { %909 = vmatprep.subr.bf16.mxu0 %v1193_v0  ;;  %v209_v38 = vpack.c.bf16 %v191_v34, %v190_v33  ;;  %v193_v40 = vld [vmem:[#allocation7 + $0x98] sm:$0xff]  ;;  %v194_v42 = vld [vmem:[#allocation7 + $0xa0] sm:$0xff]  ;;  %v195_v43 = vld [vmem:[#allocation7 + $0xa8] sm:$0xff]  ;;  %p1144_p0 = pnand %p1143_p13, %p1137_p10 }
  0x40   :  { %v210_v41 = vpack.c.bf16 %v193_v40, %v192_v39  ;;  %v211_v44 = vpack.c.bf16 %v195_v43, %v194_v42  ;;  %v196_v45 = vld [vmem:[#allocation7 + $0xb0] sm:$0xff]  ;;  %v197_v46 = vld [vmem:[#allocation7 + $0xb8] sm:$0xff]  ;;  %v198_v48 = vld [vmem:[#allocation7 + $0xc0] sm:$0xff] }
  0x41   :  { %v212_v47 = vpack.c.bf16 %v197_v46, %v196_v45  ;;  %v199_v49 = vld [vmem:[#allocation7 + $0xc8] sm:$0xff]  ;;  %v200_v51 = vld [vmem:[#allocation7 + $0xd0] sm:$0xff]  ;;  %v201_v52 = vld [vmem:[#allocation7 + $0xd8] sm:$0xff] }
  0x42   :  { %910 = vmatpush3.bf16.msra.mxu0 %v88_v9  ;;  %v213_v50 = vpack.c.bf16 %v199_v49, %v198_v48  ;;  %v214_v53 = vpack.c.bf16 %v201_v52, %v200_v51  ;;  %v202_v54 = vld [vmem:[#allocation7 + $0xe0] sm:$0xff]  ;;  %v203_v55 = vld [vmem:[#allocation7 + $0xe8] sm:$0xff]  ;;  %v204_v57 = vld [vmem:[#allocation7 + $0xf0] sm:$0xff] }
  0x43   :  { %911 = vmatprep.subr.bf16.mxu0 %v1193_v0  ;;  %v215_v56 = vpack.c.bf16 %v203_v55, %v202_v54  ;;  %v205_v58 = vld [vmem:[#allocation7 + $0xf8] sm:$0xff]  ;;  %v822_v60 = vld [vmem:[%s1422_s3] ss:$0 sm:$0xff]  ;;  %v310_v8 = vld [vmem:[#allocation7 + $0x108] sm:$0xff] }
  0x44   :  { %v216_v59 = vpack.c.bf16 %v205_v58, %v204_v57  ;;  %v309_v7 = vld [vmem:[#allocation7 + $0x100] sm:$0xff]  ;;  %v311_v9 = vld [vmem:[#allocation7 + $0x110] sm:$0xff]  ;;  %v312_v11 = vld [vmem:[#allocation7 + $0x118] sm:$0xff] }
  0x45   :  { %v328_v10 = vpack.c.bf16 %v310_v8, %v309_v7  ;;  %v313_v13 = vld [vmem:[#allocation7 + $0x120] sm:$0xff]  ;;  %v314_v14 = vld [vmem:[#allocation7 + $0x128] sm:$0xff]  ;;  %v315_v16 = vld [vmem:[#allocation7 + $0x130] sm:$0xff] }
  0x46   :  { %912 = vmatpush3.bf16.msra.mxu0 %v89_v12  ;;  %v329_v12 = vpack.c.bf16 %v312_v11, %v311_v9  ;;  %v316_v17 = vld [vmem:[#allocation7 + $0x138] sm:$0xff]  ;;  %v317_v19 = vld [vmem:[#allocation7 + $0x140] sm:$0xff]  ;;  %v318_v20 = vld [vmem:[#allocation7 + $0x148] sm:$0xff] }
  0x47   :  { %913 = vmatprep.subr.bf16.mxu0 %v1193_v0  ;;  %v319_v22 = vld [vmem:[#allocation7 + $0x150] sm:$0xff]  ;;  %v320_v23 = vld [vmem:[#allocation7 + $0x158] sm:$0xff]  ;;  %v321_v30 = vld [vmem:[#allocation7 + $0x160] sm:$0xff] }
  0x48   :  { %v322_v31 = vld [vmem:[#allocation7 + $0x168] sm:$0xff]  ;;  %v323_v33 = vld [vmem:[#allocation7 + $0x170] sm:$0xff]  ;;  %v324_v34 = vld [vmem:[#allocation7 + $0x178] sm:$0xff] }
  0x49   :  { %v431_v51 = vld [vmem:[#allocation7 + $0x188] sm:$0xff]  ;;  %v432_v55 = vld [vmem:[#allocation7 + $0x190] sm:$0xff]  ;;  %v434_v58 = vld [vmem:[#allocation7 + $0x1a0] sm:$0xff] }
  0x4a   :  { %914 = vmatpush3.bf16.msra.mxu0 %v90_v15  ;;  %v330_v15 = vpack.c.bf16 %v314_v14, %v313_v13  ;;  %v442_v7 = vld [vmem:[#allocation7 + $0x1e0] sm:$0xff]  ;;  %v443_v8 = vld [vmem:[#allocation7 + $0x1e8] sm:$0xff]  ;;  %v445_v11 = vld [vmem:[#allocation7 + $0x1f8] sm:$0xff] }
  0x4b   :  { %915 = vmatprep.subr.bf16.mxu0 %v1193_v0  ;;  %v455_v9 = vpack.c.bf16 %v443_v8, %v442_v7  ;;  %v828_v13 = vld [vmem:[%s1422_s3 + $0x2] ss:$0 sm:$0xff]  ;;  %v670_v8 = vld [vmem:[#allocation7 + $0x290] sm:$0xff] }
  0x4e   :  { %916 = vmatpush3.bf16.msra.mxu0 %v91_v18  ;;  %v331_v18 = vpack.c.bf16 %v316_v17, %v315_v16 }
  0x4f   :  { %917 = vmatprep.subr.bf16.mxu0 %v1193_v0 }
  0x52   :  { %918 = vmatpush3.bf16.msra.mxu0 %v92_v21  ;;  %v332_v21 = vpack.c.bf16 %v318_v20, %v317_v19 }
  0x53   :  { %919 = vmatprep.subr.bf16.mxu0 %v1193_v0 }
  0x56   :  { %920 = vmatpush3.bf16.msra.mxu0 %v93_v24  ;;  %v333_v24 = vpack.c.bf16 %v320_v23, %v319_v22 }
  0x57   :  { %951 = vmatprep.subr.bf16.mxu0 %v1193_v0 }
  0x59   :  { %922 = vmatmul.mubr.bf16.vlgmr.msra.gmra.mrb[0].mxu0 %v85_v27 }
  0x5a   :  { %953 = vmatprep.mubr.msk.bf16.mxu0 %vm1194_vm0, %v1193_v0 }
 0x12c   :  { %v128_v28 = vpop.f32.mrb[0].mxu0 }
 0x12d   :  { %v923_v29 = vpop.f32.mrb[1].mxu0 }
 0x12e   :  { %v131_v32 = vpop.f32.mrb[2].mxu0 }
 0x12f   :  { %v135_v35 = vpack.c.bf16 %v131_v32, %v128_v28  ;;  %v924_v36 = vpop.f32.mrb[3].mxu0  ;;  %v334_v32 = vpack.c.bf16 %v322_v31, %v321_v30  ;;  %v551_v31 = vld [vmem:[#allocation7 + $0x210] sm:$0xff] }
 0x130   :  { %v825_v36 = vld [vmem:[%s1422_s3 + $0x1] ss:$0 sm:$0xff] }
 0x131   :  { %926 = vmatpush3.bf16.msra.mxu1 %v135_v35  ;;  %v335_v35 = vpack.c.bf16 %v324_v34, %v323_v33  ;;  %v553_v34 = vld [vmem:[#allocation7 + $0x220] sm:$0xff] }
 0x132   :  { %931 = vmatprep.subr.bf16.mxu1 %v1193_v0 }
 0x134   :  { %928 = vmatmul.mubr.msk.bf16.vlgmr.msra.gmra.mrb[0].mxu1 %vm142_vm1, %v1295_v37 }
 0x135   :  { %932 = vmatpush3.bf16.msra.mxu1 %v209_v38  ;;  %947 = vmatprep.mubr.msk.bf16.mxu1 %vm1194_vm0, %v1193_v0 }
 0x136   :  { %933 = vmatprep.subr.bf16.mxu1 %v1193_v0 }
 0x139   :  { %934 = vmatpush3.bf16.msra.mxu1 %v210_v41 }
 0x13a   :  { %935 = vmatprep.subr.bf16.mxu1 %v1193_v0 }
 0x13d   :  { %936 = vmatpush3.bf16.msra.mxu1 %v211_v44 }
 0x13e   :  { %937 = vmatprep.subr.bf16.mxu1 %v1193_v0 }
 0x141   :  { %938 = vmatpush3.bf16.msra.mxu1 %v212_v47 }
 0x142   :  { %939 = vmatprep.subr.bf16.mxu1 %v1193_v0 }
 0x145   :  { %940 = vmatpush3.bf16.msra.mxu1 %v213_v50  ;;  %v430_v50 = vld [vmem:[#allocation7 + $0x180] sm:$0xff] }
 0x146   :  { %941 = vmatprep.subr.bf16.mxu1 %v1193_v0  ;;  %v449_v54 = vpack.c.bf16 %v431_v51, %v430_v50  ;;  %v563_v50 = vld [vmem:[#allocation7 + $0x270] sm:$0xff]  ;;  %v564_v51 = vld [vmem:[#allocation7 + $0x278] sm:$0xff] }
 0x149   :  { %942 = vmatpush3.bf16.msra.mxu1 %v214_v53 }
 0x14a   :  { %943 = vmatprep.subr.bf16.mxu1 %v1193_v0 }
 0x14d   :  { %944 = vmatpush3.bf16.msra.mxu1 %v215_v56  ;;  %v433_v56 = vld [vmem:[#allocation7 + $0x198] sm:$0xff] }
 0x14e   :  { %945 = vmatprep.subr.bf16.mxu1 %v1193_v0  ;;  %v450_v57 = vpack.c.bf16 %v433_v56, %v432_v55 }
 0x151   :  { %946 = vmatpush3.bf16.msra.mxu1 %v216_v59  ;;  %v435_v59 = vld [vmem:[#allocation7 + $0x1a8] sm:$0xff] }
 0x152   :  { %957 = vmatprep.subr.bf16.mxu1 %v1193_v0 }
 0x207   :  { %v180_v61 = vpop.f32.mrb[0].mxu1 }
 0x208   :  { %v181_v62 = vadd.f32 %v822_v60, %v180_v61  ;;  %v929_v63 = vpop.f32.mrb[1].mxu1  ;;  %v436_v61 = vld [vmem:[#allocation7 + $0x1b0] sm:$0xff] }
 0x209   :  { %v183_v1 = vpop.f32.mrb[2].mxu1 }
 0x20a   :  { %v184_v2 = vadd.f32 %v822_v60, %v183_v1  ;;  %v930_v3 = vpop.f32.mrb[3].mxu1  ;;  %v187_v4 = vmax.f32 %v181_v62, 0.0  ;;  %v451_v60 = vpack.c.bf16 %v435_v59, %v434_v58  ;;  %v437_v62 = vld [vmem:[#allocation7 + $0x1b8] sm:$0xff]  ;;  %v438_v1 = vld [vmem:[#allocation7 + $0x1c0] sm:$0xff] }
 0x20b   :  { %v452_v63 = vpack.c.bf16 %v437_v62, %v436_v61 }
 0x20c   :  { %v188_v5 = vmax.f32 %v184_v2, 0.0  ;;  %v439_v2 = vld [vmem:[#allocation7 + $0x1c8] sm:$0xff] }
 0x20d   :  { %v453_v3 = vpack.c.bf16 %v439_v2, %v438_v1 }
 0x20e   :  { %v208_v6 = vpack.c.bf16 %v188_v5, %v187_v4  ;;  %v440_v4 = vld [vmem:[#allocation7 + $0x1d0] sm:$0xff]  ;;  %v441_v5 = vld [vmem:[#allocation7 + $0x1d8] sm:$0xff] }
 0x210   :  { %948 = vmatmul.mubr.bf16.vlgmr.msra.gmra.mrb[4].mxu1 %v208_v6  ;;  %v454_v6 = vpack.c.bf16 %v441_v5, %v440_v4  ;;  %v669_v4 = vld [vmem:[#allocation7 + $0x288] sm:$0xff] }
 0x211   :  { %973 = vmatprep.mubr.msk.bf16.mxu1 %vm1194_vm0, %v1193_v0  ;;  %958 = vmatpush3.bf16.msra.mxu1 %v328_v10  ;;  %v444_v10 = vld [vmem:[#allocation7 + $0x1f0] sm:$0xff] }
 0x212   :  { %959 = vmatprep.subr.bf16.mxu1 %v1193_v0 }
 0x215   :  { %960 = vmatpush3.bf16.msra.mxu1 %v329_v12  ;;  %v456_v12 = vpack.c.bf16 %v445_v11, %v444_v10  ;;  %v672_v11 = vld [vmem:[#allocation7 + $0x2a0] sm:$0xff] }
 0x216   :  { %961 = vmatprep.subr.bf16.mxu1 %v1193_v0 }
 0x219   :  { %962 = vmatpush3.bf16.msra.mxu1 %v330_v15 }
 0x21a   :  { %963 = vmatprep.subr.bf16.mxu1 %v1193_v0 }
 0x21d   :  { %964 = vmatpush3.bf16.msra.mxu1 %v331_v18 }
 0x21e   :  { %965 = vmatprep.subr.bf16.mxu1 %v1193_v0 }
 0x221   :  { %966 = vmatpush3.bf16.msra.mxu1 %v332_v21 }
 0x222   :  { %967 = vmatprep.subr.bf16.mxu1 %v1193_v0 }
 0x225   :  { %968 = vmatpush3.bf16.msra.mxu1 %v333_v24 }
 0x226   :  { %969 = vmatprep.subr.bf16.mxu1 %v1193_v0 }
 0x229   :  { %970 = vmatpush3.bf16.msra.mxu1 %v334_v32  ;;  %v552_v32 = vld [vmem:[#allocation7 + $0x218] sm:$0xff] }
 0x22a   :  { %971 = vmatprep.subr.bf16.mxu1 %v1193_v0  ;;  %v569_v33 = vpack.c.bf16 %v552_v32, %v551_v31 }
 0x22d   :  { %972 = vmatpush3.bf16.msra.mxu1 %v335_v35  ;;  %v554_v35 = vld [vmem:[#allocation7 + $0x228] sm:$0xff] }
 0x22e   :  { %1003 = vmatprep.subr.bf16.mxu1 %v1193_v0 }
 0x2e3   :  { %v251_v25 = vpop.f32.mrb[4].mxu1 }
 0x2e4   :  { %v949_v26 = vpop.f32.mrb[5].mxu1 }
 0x2e5   :  { %v254_v27 = vpop.f32.mrb[6].mxu1  ;;  %v549_v26 = vld [vmem:[#allocation7 + $0x200] sm:$0xff] }
 0x2e6   :  { %v258_v28 = vpack.c.bf16 %v254_v27, %v251_v25  ;;  %v950_v29 = vpop.f32.mrb[7].mxu1  ;;  %v550_v27 = vld [vmem:[#allocation7 + $0x208] sm:$0xff] }
 0x2e7   :  { %v568_v30 = vpack.c.bf16 %v550_v27, %v549_v26  ;;  %v682_v26 = vld [vmem:[#allocation7 + $0x2f0] sm:$0xff]  ;;  %v683_v27 = vld [vmem:[#allocation7 + $0x2f8] sm:$0xff] }
 0x2e8   :  { %952 = vmatpush3.bf16.msra.mxu0 %v258_v28 }
 0x2e9   :  { %977 = vmatprep.subr.bf16.mxu0 %v1193_v0 }
 0x2eb   :  { %954 = vmatmul.mubr.msk.bf16.vlgmr.msra.gmra.mrb[4].mxu0 %vm142_vm1, %v1295_v37 }
 0x2ec   :  { %979 = vmatprep.mubr.msk.bf16.mxu0 %vm1194_vm0, %v1193_v0 }
 0x3be   :  { %v299_v38 = vpop.f32.mrb[4].mxu0 }
 0x3bf   :  { %v300_v39 = vadd.f32 %v825_v36, %v299_v38  ;;  %v955_v40 = vpop.f32.mrb[5].mxu0  ;;  %v555_v38 = vld [vmem:[#allocation7 + $0x230] sm:$0xff] }
 0x3c0   :  { %v302_v41 = vpop.f32.mrb[6].mxu0 }
 0x3c1   :  { %v303_v42 = vadd.f32 %v825_v36, %v302_v41  ;;  %v956_v43 = vpop.f32.mrb[7].mxu0  ;;  %v306_v44 = vmax.f32 %v300_v39, 0.0  ;;  %v570_v36 = vpack.c.bf16 %v554_v35, %v553_v34  ;;  %v556_v39 = vld [vmem:[#allocation7 + $0x238] sm:$0xff]  ;;  %v557_v41 = vld [vmem:[#allocation7 + $0x240] sm:$0xff] }
 0x3c2   :  { %v571_v40 = vpack.c.bf16 %v556_v39, %v555_v38 }
 0x3c3   :  { %v307_v45 = vmax.f32 %v303_v42, 0.0  ;;  %v558_v42 = vld [vmem:[#allocation7 + $0x248] sm:$0xff] }
 0x3c4   :  { %v572_v43 = vpack.c.bf16 %v558_v42, %v557_v41 }
 0x3c5   :  { %v327_v46 = vpack.c.bf16 %v307_v45, %v306_v44  ;;  %v559_v44 = vld [vmem:[#allocation7 + $0x250] sm:$0xff]  ;;  %v560_v45 = vld [vmem:[#allocation7 + $0x258] sm:$0xff] }
 0x3c7   :  { %974 = vmatmul.mubr.bf16.vlgmr.msra.gmra.mrb[8].mxu1 %v327_v46  ;;  %v573_v46 = vpack.c.bf16 %v560_v45, %v559_v44 }
 0x3c8   :  { %1005 = vmatprep.mubr.msk.bf16.mxu1 %vm1194_vm0, %v1193_v0 }
 0x49a   :  { %v370_v47 = vpop.f32.mrb[8].mxu1 }
 0x49b   :  { %v975_v48 = vpop.f32.mrb[9].mxu1 }
 0x49c   :  { %v373_v49 = vpop.f32.mrb[10].mxu1  ;;  %v562_v48 = vld [vmem:[#allocation7 + $0x268] sm:$0xff] }
 0x49d   :  { %v377_v52 = vpack.c.bf16 %v373_v49, %v370_v47  ;;  %v976_v53 = vpop.f32.mrb[11].mxu1  ;;  %v561_v47 = vld [vmem:[#allocation7 + $0x260] sm:$0xff] }
 0x49e   :  { %v574_v49 = vpack.c.bf16 %v562_v48, %v561_v47  ;;  %v831_v53 = vld [vmem:[%s1422_s3 + $0x3] ss:$0 sm:$0xff] }
 0x49f   :  { %978 = vmatpush3.bf16.msra.mxu0 %v377_v52  ;;  %v575_v52 = vpack.c.bf16 %v564_v51, %v563_v50 }
 0x4a0   :  { %983 = vmatprep.subr.bf16.mxu0 %v1193_v0 }
 0x4a2   :  { %980 = vmatmul.mubr.msk.bf16.vlgmr.msra.gmra.mrb[8].mxu0 %vm142_vm1, %v1295_v37 }
 0x4a3   :  { %984 = vmatpush3.bf16.msra.mxu0 %v449_v54  ;;  %999 = vmatprep.mubr.msk.bf16.mxu0 %vm1194_vm0, %v1193_v0 }
 0x4a4   :  { %985 = vmatprep.subr.bf16.mxu0 %v1193_v0 }
 0x4a7   :  { %986 = vmatpush3.bf16.msra.mxu0 %v450_v57 }
 0x4a8   :  { %987 = vmatprep.subr.bf16.mxu0 %v1193_v0 }
 0x4ab   :  { %988 = vmatpush3.bf16.msra.mxu0 %v451_v60 }
 0x4ac   :  { %989 = vmatprep.subr.bf16.mxu0 %v1193_v0 }
 0x4af   :  { %990 = vmatpush3.bf16.msra.mxu0 %v452_v63 }
 0x4b0   :  { %991 = vmatprep.subr.bf16.mxu0 %v1193_v0 }
 0x4b3   :  { %992 = vmatpush3.bf16.msra.mxu0 %v453_v3  ;;  %v668_v3 = vld [vmem:[#allocation7 + $0x280] sm:$0xff] }
 0x4b4   :  { %993 = vmatprep.subr.bf16.mxu0 %v1193_v0  ;;  %v687_v7 = vpack.c.bf16 %v669_v4, %v668_v3 }
 0x4b7   :  { %994 = vmatpush3.bf16.msra.mxu0 %v454_v6 }
 0x4b8   :  { %995 = vmatprep.subr.bf16.mxu0 %v1193_v0 }
 0x4bb   :  { %996 = vmatpush3.bf16.msra.mxu0 %v455_v9  ;;  %v671_v9 = vld [vmem:[#allocation7 + $0x298] sm:$0xff] }
 0x4bc   :  { %997 = vmatprep.subr.bf16.mxu0 %v1193_v0  ;;  %v688_v10 = vpack.c.bf16 %v671_v9, %v670_v8 }
 0x4bf   :  { %998 = vmatpush3.bf16.msra.mxu0 %v456_v12  ;;  %v673_v12 = vld [vmem:[#allocation7 + $0x2a8] sm:$0xff] }
 0x4c0   :  { %1029 = vmatprep.subr.bf16.mxu0 %v1193_v0 }
 0x575   :  { %v418_v14 = vpop.f32.mrb[8].mxu0 }
 0x576   :  { %v419_v15 = vadd.f32 %v828_v13, %v418_v14  ;;  %v981_v16 = vpop.f32.mrb[9].mxu0  ;;  %v674_v14 = vld [vmem:[#allocation7 + $0x2b0] sm:$0xff] }
 0x577   :  { %v421_v17 = vpop.f32.mrb[10].mxu0 }
 0x578   :  { %v425_v18 = vmax.f32 %v419_v15, 0.0  ;;  %v422_v19 = vadd.f32 %v828_v13, %v421_v17  ;;  %v982_v20 = vpop.f32.mrb[11].mxu0  ;;  %v689_v13 = vpack.c.bf16 %v673_v12, %v672_v11  ;;  %v675_v15 = vld [vmem:[#allocation7 + $0x2b8] sm:$0xff]  ;;  %v676_v17 = vld [vmem:[#allocation7 + $0x2c0] sm:$0xff] }
 0x579   :  { %v690_v16 = vpack.c.bf16 %v675_v15, %v674_v14  ;;  %v678_v20 = vld [vmem:[#allocation7 + $0x2d0] sm:$0xff] }
 0x57a   :  { %427 = vst [vmem:[#allocation9] sm:$0xff] %v425_v18  ;;  %v426_v21 = vmax.f32 %v422_v19, 0.0 }
 0x57c   :  { %428 = vst [vmem:[#allocation9 + $0x8] sm:$0xff] %v426_v21  ;;  %v448_v22 = vpack.c.bf16 %v426_v21, %v425_v18  ;;  %v677_v18 = vld [vmem:[#allocation7 + $0x2c8] sm:$0xff]  ;;  %v679_v21 = vld [vmem:[#allocation7 + $0x2d8] sm:$0xff] }
 0x57d   :  { %v691_v19 = vpack.c.bf16 %v677_v18, %v676_v17 }
 0x57e   :  { %1000 = vmatmul.mubr.bf16.vlgmr.msra.gmra.mrb[12].mxu0 %v448_v22  ;;  %v692_v22 = vpack.c.bf16 %v679_v21, %v678_v20 }
 0x57f   :  { %1031 = vmatprep.mubr.msk.bf16.mxu0 %vm1194_vm0, %v1193_v0 }
 0x651   :  { %v491_v23 = vpop.f32.mrb[12].mxu0 }
 0x652   :  { %v1001_v24 = vpop.f32.mrb[13].mxu0 }
 0x653   :  { %v494_v25 = vpop.f32.mrb[14].mxu0  ;;  %v681_v24 = vld [vmem:[#allocation7 + $0x2e8] sm:$0xff] }
 0x654   :  { %v498_v28 = vpack.c.bf16 %v494_v25, %v491_v23  ;;  %v1002_v29 = vpop.f32.mrb[15].mxu0  ;;  %v680_v23 = vld [vmem:[#allocation7 + $0x2e0] sm:$0xff] }
 0x655   :  { %v693_v25 = vpack.c.bf16 %v681_v24, %v680_v23  ;;  %v834_v29 = vld [vmem:[%s1422_s3 + $0x4] ss:$0 sm:$0xff] }
 0x656   :  { %1004 = vmatpush3.bf16.msra.mxu1 %v498_v28  ;;  %v694_v28 = vpack.c.bf16 %v683_v27, %v682_v26 }
 0x657   :  { %1009 = vmatprep.subr.bf16.mxu1 %v1193_v0 }
 0x659   :  { %1006 = vmatmul.mubr.msk.bf16.vlgmr.msra.gmra.mrb[12].mxu1 %vm142_vm1, %v1295_v37 }
 0x65a   :  { %1010 = vmatpush3.bf16.msra.mxu1 %v568_v30  ;;  %1025 = vmatprep.mubr.msk.bf16.mxu1 %vm1194_vm0, %v1193_v0 }
 0x65b   :  { %1011 = vmatprep.subr.bf16.mxu1 %v1193_v0 }
 0x65e   :  { %1012 = vmatpush3.bf16.msra.mxu1 %v569_v33 }
 0x65f   :  { %1013 = vmatprep.subr.bf16.mxu1 %v1193_v0 }
 0x662   :  { %1014 = vmatpush3.bf16.msra.mxu1 %v570_v36 }
 0x663   :  { %1015 = vmatprep.subr.bf16.mxu1 %v1193_v0 }
 0x666   :  { %1016 = vmatpush3.bf16.msra.mxu1 %v571_v40 }
 0x667   :  { %1017 = vmatprep.subr.bf16.mxu1 %v1193_v0 }
 0x66a   :  { %1018 = vmatpush3.bf16.msra.mxu1 %v572_v43 }
 0x66b   :  { %1019 = vmatprep.subr.bf16.mxu1 %v1193_v0 }
 0x66e   :  { %1020 = vmatpush3.bf16.msra.mxu1 %v573_v46 }
 0x66f   :  { %1021 = vmatprep.subr.bf16.mxu1 %v1193_v0 }
 0x672   :  { %1022 = vmatpush3.bf16.msra.mxu1 %v574_v49 }
 0x673   :  { %1023 = vmatprep.subr.bf16.mxu1 %v1193_v0 }
 0x676   :  { %1024 = vmatpush3.bf16.msra.mxu1 %v575_v52 }
 0x677   :  { %1055 = vmatprep.subr.bf16.mxu1 %v1193_v0 }
 0x72c   :  { %v539_v54 = vpop.f32.mrb[12].mxu1 }
 0x72d   :  { %v540_v55 = vadd.f32 %v831_v53, %v539_v54  ;;  %v1007_v56 = vpop.f32.mrb[13].mxu1 }
 0x72e   :  { %v542_v57 = vpop.f32.mrb[14].mxu1 }
 0x72f   :  { %v543_v58 = vadd.f32 %v831_v53, %v542_v57  ;;  %v1008_v59 = vpop.f32.mrb[15].mxu1  ;;  %v546_v60 = vmax.f32 %v540_v55, 0.0 }
 0x731   :  { %v547_v61 = vmax.f32 %v543_v58, 0.0 }
 0x733   :  { %v567_v62 = vpack.c.bf16 %v547_v61, %v546_v60 }
 0x735   :  { %1026 = vmatmul.mubr.bf16.vlgmr.msra.gmra.mrb[16].mxu1 %v567_v62 }
 0x736   :  { %1057 = vmatprep.mubr.msk.bf16.mxu1 %vm1194_vm0, %v1193_v0 }
 0x808   :  { %v610_v63 = vpop.f32.mrb[16].mxu1 }
 0x809   :  { %v1027_v1 = vpop.f32.mrb[17].mxu1 }
 0x80a   :  { %v613_v2 = vpop.f32.mrb[18].mxu1 }
 0x80b   :  { %v617_v5 = vpack.c.bf16 %v613_v2, %v610_v63  ;;  %v1028_v6 = vpop.f32.mrb[19].mxu1 }
 0x80d   :  { %1030 = vmatpush3.bf16.msra.mxu0 %v617_v5 }
 0x80e   :  { %1035 = vmatprep.subr.bf16.mxu0 %v1193_v0 }
 0x810   :  { %1032 = vmatmul.mubr.msk.bf16.vlgmr.msra.gmra.mrb[16].mxu0 %vm142_vm1, %v1295_v37 }
 0x811   :  { %1036 = vmatpush3.bf16.msra.mxu0 %v687_v7  ;;  %1051 = vmatprep.mubr.msk.bf16.mxu0 %vm1194_vm0, %v1193_v0 }
 0x812   :  { %1037 = vmatprep.subr.bf16.mxu0 %v1193_v0 }
 0x815   :  { %1038 = vmatpush3.bf16.msra.mxu0 %v688_v10 }
 0x816   :  { %1039 = vmatprep.subr.bf16.mxu0 %v1193_v0 }
 0x819   :  { %1040 = vmatpush3.bf16.msra.mxu0 %v689_v13 }
 0x81a   :  { %1041 = vmatprep.subr.bf16.mxu0 %v1193_v0 }
 0x81d   :  { %1042 = vmatpush3.bf16.msra.mxu0 %v690_v16 }
 0x81e   :  { %1043 = vmatprep.subr.bf16.mxu0 %v1193_v0 }
 0x821   :  { %1044 = vmatpush3.bf16.msra.mxu0 %v691_v19 }
 0x822   :  { %1045 = vmatprep.subr.bf16.mxu0 %v1193_v0 }
 0x825   :  { %1046 = vmatpush3.bf16.msra.mxu0 %v692_v22 }
 0x826   :  { %1047 = vmatprep.subr.bf16.mxu0 %v1193_v0 }
 0x829   :  { %1048 = vmatpush3.bf16.msra.mxu0 %v693_v25 }
 0x82a   :  { %1049 = vmatprep.subr.bf16.mxu0 %v1193_v0 }
 0x82d   :  { %1050 = vmatpush3.bf16.msra.mxu0 %v694_v28 }
 0x8e3   :  { %v658_v30 = vpop.f32.mrb[16].mxu0 }
 0x8e4   :  { %v659_v31 = vadd.f32 %v834_v29, %v658_v30  ;;  %v1033_v32 = vpop.f32.mrb[17].mxu0 }
 0x8e5   :  { %v661_v33 = vpop.f32.mrb[18].mxu0 }
 0x8e6   :  { %v662_v34 = vadd.f32 %v834_v29, %v661_v33  ;;  %v1034_v35 = vpop.f32.mrb[19].mxu0  ;;  %v665_v36 = vmax.f32 %v659_v31, 0.0 }
 0x8e8   :  { %v666_v38 = vmax.f32 %v662_v34, 0.0 }
 0x8ea   :  { %v686_v39 = vpack.c.bf16 %v666_v38, %v665_v36 }
 0x8ec   :  { %1052 = vmatmul.mubr.bf16.vlgmr.msra.gmra.mrb[20].mxu0 %v686_v39 }
 0x9bf   :  { %v729_v40 = vpop.f32.mrb[20].mxu0 }
 0x9c0   :  { %v1053_v0 = vpop.f32.mrb[21].mxu0 }
 0x9c1   :  { %v732_v41 = vpop.f32.mrb[22].mxu0 }
 0x9c2   :  { %v736_v42 = vpack.c.bf16 %v732_v41, %v729_v40  ;;  %v1054_v43 = vpop.f32.mrb[23].mxu0 }
 0x9c4   :  { %1056 = vmatpush3.bf16.msra.mxu1 %v736_v42 }
 0x9c7   :  { %1058 = vmatmul.mubr.msk.bf16.vlgmr.msra.gmra.mrb[20].mxu1 %vm142_vm1, %v1295_v37 }
 0x9c8   :  { %1147 = shalt.err (!%p1144_p0)
}
 0x9c9   :  { %s1148_s19 = scalar_lea.hbm %s1424_s5, 256 }
 0x9ca   :  { %p1149_p1 = scmp.ne.s32.totalorder %s1424_s5, %s1148_s19  ;;  %p1152_p2 = scmp.lt.u32.totalorder %s1148_s19, %s1424_s5 }
 0x9cc   :  { %p1154_p3 = pnand %p1152_p2, %p1149_p1 }
 0x9ce   :  { %1157 = shalt.err (!%p1154_p3)
}
 0x9cf   :  { %811 = dma.vmem_to_hbm [thread:$0]  %s806_s16, 256, %s1424_s5, [#allocation10], %s1190_s30, %s1190_s30, %s1191_s6  }
 0x9d0   :  { %v837_v37 = vld [vmem:[%s1422_s3 + $0x5] ss:$0 sm:$0xff]  ;;  %s1196_s0 = smov [#allocation8]  }
 0x9d1   :  { %s793_s21 = sshll.u32 %s1196_s0, 4  ;;  %s794_s21 = int_to_ptr.vmem [resolvable:$true] %s793_s21 }
 0x9d2   :  { %s1158_s2 = scalar_lea.vmem %s794_s21, 256  ;;  %p1163_p5 = scmp.lt.s32.totalorder %s794_s21, %s794_s21 }
 0x9d3   :  { %p1159_p4 = scmp.ne.s32.totalorder %s794_s21, %s1158_s2  ;;  %p1164_p6 = scmp.lt.s32.totalorder %s1158_s2, %s1158_s2 }
 0x9d5   :  { %p1165_p7 = por %p1164_p6, %p1163_p5 }
 0x9d7   :  { %p1166_p8 = pnand %p1165_p7, %p1159_p4 }
 0xa9a   :  { %v777_v44 = vpop.f32.mrb[20].mxu1 }
 0xa9b   :  { %v778_v45 = vadd.f32 %v837_v37, %v777_v44  ;;  %v1059_v46 = vpop.f32.mrb[21].mxu1 }
 0xa9c   :  { %v780_v47 = vpop.f32.mrb[22].mxu1 }
 0xa9d   :  { %v784_v48 = vmax.f32 %v778_v45, 0.0  ;;  %v781_v49 = vadd.f32 %v837_v37, %v780_v47  ;;  %v1060_v50 = vpop.f32.mrb[23].mxu1 }
 0xa9f   :  { %786 = vst [vmem:[#allocation8] sm:$0xff] %v784_v48  ;;  %v785_v51 = vmax.f32 %v781_v49, 0.0 }
 0xaa1   :  { %787 = vst [vmem:[#allocation8 + $0x8] sm:$0xff] %v785_v51 }
 0xaa2   :  { %1169 = shalt.err (!%p1166_p8)
}
 0xaa3   :  { %s1170_s29 = scalar_lea.hbm %s1423_s4, 256 }
 0xaa4   :  { %p1171_p9 = scmp.ne.s32.totalorder %s1423_s4, %s1170_s29  ;;  %p1174_p10 = scmp.lt.u32.totalorder %s1170_s29, %s1423_s4 }
 0xaa6   :  { %p1176_p11 = pnand %p1174_p10, %p1171_p9 }
 0xaa8   :  { %1179 = shalt.err (!%p1176_p11)
}
 0xaa9   :  { %799 = dma.vmem_to_hbm [thread:$0]  %s794_s21, 256, %s1423_s4, [#allocation4], %s1190_s30, %s1190_s30, %s1191_s6  }
 0xaaa   :  { %1184 = dma.done.wait [#allocation4], 256  }
 0xaab   :  { %1185 = vsyncadd [#allocation4], 4294967040 }
 0xaac   :  { %1186 = dma.done.wait [#allocation10], 256  }
 0xaad   :  { %1187 = vsyncadd [#allocation10], 4294967040 }
 0xaae   :  { %818 = vsyncpa [#allocation3], 1 }
 0xaaf   :  { %819 = vsyncpa [#allocation6], 1 }
 0xab0   :  { %820 = vsyncpa [#allocation4], 1 }
 0xab1   :  { %821 = vsyncpa [#allocation10], 1 }

</bundles_post_ra>
